<compile_context>
chip_gen: v5e
topology: v5e:2x2
jax: 0.10.0
libtpu: 0.0.40
codegen_flags: <defaults>
</compile_context>

<pallas_src>
from functools import partial

import jax
import jax.numpy as jnp
from jax.experimental import pallas as pl
from jax.experimental.pallas import tpu as pltpu

IN_FEATURES = 4
HIDDEN2 = 16
LANE = 128
SUBLANE = 8

# Offsets inside the packed (54,) SMEM parameter vector:
#   [w1(4), b1(1), w2(16), b2(16), w3(16), b3(1)]
_W1, _B1, _W2, _B2, _W3, _B3 = 0, 4, 5, 21, 37, 53
_NPARAMS = 54


def _round_up(n, m):
    return ((n + m - 1) // m) * m


def mlp_kernel(x_ref, p_ref, o_ref):
    """One batch tile, entirely on the VPU.

    x_ref : (4, R, 128)  features on the leading axis, batch on sublanes+lanes
    p_ref : (54,)        packed weights/biases in SMEM
    o_ref : (R, 128)     lane/sublane-dense output tile
    """
    # ---- layer 1: h1 = relu(sum_k w1[k] * x[k] + b1) ------------- (R, 128)
    h1 = (p_ref[_W1 + 0] * x_ref[0]
          + p_ref[_W1 + 1] * x_ref[1]
          + p_ref[_W1 + 2] * x_ref[2]
          + p_ref[_W1 + 3] * x_ref[3]
          + p_ref[_B1])
    h1 = jnp.maximum(h1, 0.0)

    # ---- layers 2 + 3 fused, unrolled over the 16 hidden units ------------
    #   h2_j = relu(w2[j] * h1 + b2[j]) ;  out = sum_j w3[j] * h2_j + b3
    acc = jnp.zeros_like(h1)
    for j in range(HIDDEN2):
        h2_j = jnp.maximum(p_ref[_W2 + j] * h1 + p_ref[_B2 + j], 0.0)
        acc = acc + p_ref[_W3 + j] * h2_j

    o_ref[...] = acc + p_ref[_B3]


@partial(jax.jit, static_argnames=("b_tile_rows",))
def network_forward(x, params, *, b_tile_rows=1024):
    """Forward pass. x: (B, 4) float32 -> (B, 1) float32."""
    w1, b1, w2, b2, w3, b3 = params
    B = x.shape[0]

    # ---- choose tiling: batch lives on (rows, 128) = (sublanes, lanes) -----
    rows = pl.cdiv(B, LANE)
    if rows <= SUBLANE:
        tile_rows = rows                                   # tiny batch: 1 block
    else:
        tile_rows = min(b_tile_rows, _round_up(rows, SUBLANE))
        if rows >= 2 * SUBLANE:
            # cap so the grid has >=2 steps (v7x: both TensorCores get work)
            half = _round_up((rows + 1) // 2, SUBLANE)
            tile_rows = min(tile_rows, half)
        tile_rows = max(tile_rows, SUBLANE)
    rows_padded = _round_up(rows, tile_rows)
    padded = rows_padded * LANE
    grid = (rows_padded // tile_rows,)

    # ---- relayout (fused by XLA inside this jit): (B,4) -> (4, rows, 128) --
    xT = jnp.pad(x.astype(jnp.float32).T, ((0, 0), (0, padded - B)))
    xT = xT.reshape(IN_FEATURES, rows_padded, LANE)

    # ---- pack all weights/biases into one SMEM scalar vector ---------------
    pvec = jnp.concatenate([
        w1.reshape(-1), b1.reshape(-1), w2.reshape(-1),
        b2.reshape(-1), w3.reshape(-1), b3.reshape(-1),
    ]).astype(jnp.float32)                                 # (54,)

    out = pl.pallas_call(
        mlp_kernel,
        out_shape=jax.ShapeDtypeStruct((rows_padded, LANE), jnp.float32),
        grid=grid,
        in_specs=[
            pl.BlockSpec((IN_FEATURES, tile_rows, LANE), lambda i: (0, i, 0)),
            pl.BlockSpec(memory_space=pltpu.MemorySpace.SMEM),   # packed params
        ],
        out_specs=pl.BlockSpec((tile_rows, LANE), lambda i: (i, 0)),
        compiler_params=pltpu.CompilerParams(
            dimension_semantics=("parallel",),   # v7x: shard batch over 2 TCs
            vmem_limit_bytes=32 * 1024 * 1024,
        ),
        cost_estimate=pl.CostEstimate(
            flops=90 * padded,          # ~9 (layer1) + ~80 (layers 2+3) per elem
            transcendentals=0,
            bytes_accessed=(IN_FEATURES * padded + padded) * 4 + _NPARAMS * 4,
        ),
    )(xT, pvec)

    # Padded tail lanes compute garbage; slice them off before returning.
    return out.reshape(-1)[:B].reshape(B, 1)


def init_params(key):
    """PyTorch-style nn.Linear init (uniform +/- 1/sqrt(fan_in)), flattened.

    w1 = hidden1.weight[0, :]  (4,)    b1 = hidden1.bias  (1,)
    w2 = hidden2.weight[:, 0]  (16,)   b2 = hidden2.bias  (16,)
    w3 = output.weight[0, :]   (16,)   b3 = output.bias   (1,)
    """
    def uniform(k, shape, fan_in):
        bound = 1.0 / (float(fan_in) ** 0.5)
        return jax.random.uniform(k, shape, jnp.float32, -bound, bound)

    k = jax.random.split(key, 6)
    w1 = uniform(k[0], (IN_FEATURES,), IN_FEATURES)
    b1 = uniform(k[1], (1,), IN_FEATURES)
    w2 = uniform(k[2], (HIDDEN2,), 1)
    b2 = uniform(k[3], (HIDDEN2,), 1)
    w3 = uniform(k[4], (HIDDEN2,), HIDDEN2)
    b3 = uniform(k[5], (1,), HIDDEN2)
    return (w1, b1, w2, b2, w3, b3)


def reference_forward(x, params):
    """Plain-JAX reference (identical math to the PyTorch module)."""
    w1, b1, w2, b2, w3, b3 = params
    h1 = jnp.maximum(x @ w1[:, None] + b1, 0.0)              # (B, 1)
    h2 = jnp.maximum(h1 * w2[None, :] + b2[None, :], 0.0)    # (B, 16)
    return h2 @ w3[:, None] + b3                              # (B, 1)


if __name__ == "__main__":
    key = jax.random.PRNGKey(0)
    kx, kp = jax.random.split(key)
    params = init_params(kp)

    # Small batch (single block) and a batch that exercises multi-row tiling,
    # tail padding and a >=2-step parallel grid.
    for B in (8, 2085):
        x = jax.random.normal(jax.random.fold_in(kx, B), (B, IN_FEATURES),
                              jnp.float32)
        out = jax.block_until_ready(network_forward(x, params))
        ref = reference_forward(x, params)
        assert out.shape == (B, 1), out.shape
        assert jnp.allclose(out, ref, atol=1e-5, rtol=1e-5), (B, out, ref)

    print("KERNEL_OK")
</pallas_src>

<mosaic_0001>
module attributes {stable_mosaic.version = 11 : i64} {
  func.func @mlp_kernel(%arg0: i32, %arg1: memref<4x1x128xf32, #tpu.memory_space<vmem>>, %arg2: memref<54xf32, #tpu.memory_space<smem>>, %arg3: memref<1x128xf32, #tpu.memory_space<vmem>>) attributes {dimension_semantics = [#tpu.dimension_semantics<parallel>], iteration_bounds = array<i64: 1>, scalar_prefetch = 0 : i64, scratch_operands = 0 : i64, tpu.core_type = #tpu.core_type<tc>, window_params = [{transform_indices = @transform_0, window_bounds = array<i64: 4, 1, 128>}, {transform_indices = @transform_1, window_bounds = array<i64: 54>}, {transform_indices = @transform_2, window_bounds = array<i64: 1, 128>}]} {
    %c0 = arith.constant 0 : index
    %0 = memref.load %arg2[%c0] : memref<54xf32, #tpu.memory_space<smem>>
    %c0_0 = arith.constant 0 : index
    %c0_1 = arith.constant 0 : index
    %c0_2 = arith.constant 0 : index
    %1 = vector.load %arg1[%c0_0, %c0_1, %c0_2] : memref<4x1x128xf32, #tpu.memory_space<vmem>>, vector<1x1x128xf32>
    %2 = vector.shape_cast %1 : vector<1x1x128xf32> to vector<1x128xf32>
    %3 = vector.broadcast %0 : f32 to vector<1x128xf32>
    %4 = arith.mulf %3, %2 : vector<1x128xf32>
    %c1 = arith.constant 1 : index
    %5 = memref.load %arg2[%c1] : memref<54xf32, #tpu.memory_space<smem>>
    %c1_3 = arith.constant 1 : index
    %c0_4 = arith.constant 0 : index
    %c0_5 = arith.constant 0 : index
    %6 = vector.load %arg1[%c1_3, %c0_4, %c0_5] : memref<4x1x128xf32, #tpu.memory_space<vmem>>, vector<1x1x128xf32>
    %7 = vector.shape_cast %6 : vector<1x1x128xf32> to vector<1x128xf32>
    %8 = vector.broadcast %5 : f32 to vector<1x128xf32>
    %9 = arith.mulf %8, %7 : vector<1x128xf32>
    %10 = arith.addf %4, %9 : vector<1x128xf32>
    %c2 = arith.constant 2 : index
    %11 = memref.load %arg2[%c2] : memref<54xf32, #tpu.memory_space<smem>>
    %c2_6 = arith.constant 2 : index
    %c0_7 = arith.constant 0 : index
    %c0_8 = arith.constant 0 : index
    %12 = vector.load %arg1[%c2_6, %c0_7, %c0_8] : memref<4x1x128xf32, #tpu.memory_space<vmem>>, vector<1x1x128xf32>
    %13 = vector.shape_cast %12 : vector<1x1x128xf32> to vector<1x128xf32>
    %14 = vector.broadcast %11 : f32 to vector<1x128xf32>
    %15 = arith.mulf %14, %13 : vector<1x128xf32>
    %16 = arith.addf %10, %15 : vector<1x128xf32>
    %c3 = arith.constant 3 : index
    %17 = memref.load %arg2[%c3] : memref<54xf32, #tpu.memory_space<smem>>
    %c3_9 = arith.constant 3 : index
    %c0_10 = arith.constant 0 : index
    %c0_11 = arith.constant 0 : index
    %18 = vector.load %arg1[%c3_9, %c0_10, %c0_11] : memref<4x1x128xf32, #tpu.memory_space<vmem>>, vector<1x1x128xf32>
    %19 = vector.shape_cast %18 : vector<1x1x128xf32> to vector<1x128xf32>
    %20 = vector.broadcast %17 : f32 to vector<1x128xf32>
    %21 = arith.mulf %20, %19 : vector<1x128xf32>
    %22 = arith.addf %16, %21 : vector<1x128xf32>
    %c4 = arith.constant 4 : index
    %23 = memref.load %arg2[%c4] : memref<54xf32, #tpu.memory_space<smem>>
    %24 = vector.broadcast %23 : f32 to vector<1x128xf32>
    %25 = arith.addf %22, %24 : vector<1x128xf32>
    %cst = arith.constant 0.000000e+00 : f32
    %26 = vector.broadcast %cst : f32 to vector<1x128xf32>
    %27 = arith.maximumf %25, %26 : vector<1x128xf32>
    %cst_12 = arith.constant 0.000000e+00 : f32
    %28 = vector.broadcast %cst_12 : f32 to vector<1x128xf32>
    %c5 = arith.constant 5 : index
    %29 = memref.load %arg2[%c5] : memref<54xf32, #tpu.memory_space<smem>>
    %30 = vector.broadcast %29 : f32 to vector<1x128xf32>
    %31 = arith.mulf %30, %27 : vector<1x128xf32>
    %c21 = arith.constant 21 : index
    %32 = memref.load %arg2[%c21] : memref<54xf32, #tpu.memory_space<smem>>
    %33 = vector.broadcast %32 : f32 to vector<1x128xf32>
    %34 = arith.addf %31, %33 : vector<1x128xf32>
    %cst_13 = arith.constant 0.000000e+00 : f32
    %35 = vector.broadcast %cst_13 : f32 to vector<1x128xf32>
    %36 = arith.maximumf %34, %35 : vector<1x128xf32>
    %c37 = arith.constant 37 : index
    %37 = memref.load %arg2[%c37] : memref<54xf32, #tpu.memory_space<smem>>
    %38 = vector.broadcast %37 : f32 to vector<1x128xf32>
    %39 = arith.mulf %38, %36 : vector<1x128xf32>
    %40 = arith.addf %28, %39 : vector<1x128xf32>
    %c6 = arith.constant 6 : index
    %41 = memref.load %arg2[%c6] : memref<54xf32, #tpu.memory_space<smem>>
    %42 = vector.broadcast %41 : f32 to vector<1x128xf32>
    %43 = arith.mulf %42, %27 : vector<1x128xf32>
    %c22 = arith.constant 22 : index
    %44 = memref.load %arg2[%c22] : memref<54xf32, #tpu.memory_space<smem>>
    %45 = vector.broadcast %44 : f32 to vector<1x128xf32>
    %46 = arith.addf %43, %45 : vector<1x128xf32>
    %cst_14 = arith.constant 0.000000e+00 : f32
    %47 = vector.broadcast %cst_14 : f32 to vector<1x128xf32>
    %48 = arith.maximumf %46, %47 : vector<1x128xf32>
    %c38 = arith.constant 38 : index
    %49 = memref.load %arg2[%c38] : memref<54xf32, #tpu.memory_space<smem>>
    %50 = vector.broadcast %49 : f32 to vector<1x128xf32>
    %51 = arith.mulf %50, %48 : vector<1x128xf32>
    %52 = arith.addf %40, %51 : vector<1x128xf32>
    %c7 = arith.constant 7 : index
    %53 = memref.load %arg2[%c7] : memref<54xf32, #tpu.memory_space<smem>>
    %54 = vector.broadcast %53 : f32 to vector<1x128xf32>
    %55 = arith.mulf %54, %27 : vector<1x128xf32>
    %c23 = arith.constant 23 : index
    %56 = memref.load %arg2[%c23] : memref<54xf32, #tpu.memory_space<smem>>
    %57 = vector.broadcast %56 : f32 to vector<1x128xf32>
    %58 = arith.addf %55, %57 : vector<1x128xf32>
    %cst_15 = arith.constant 0.000000e+00 : f32
    %59 = vector.broadcast %cst_15 : f32 to vector<1x128xf32>
    %60 = arith.maximumf %58, %59 : vector<1x128xf32>
    %c39 = arith.constant 39 : index
    %61 = memref.load %arg2[%c39] : memref<54xf32, #tpu.memory_space<smem>>
    %62 = vector.broadcast %61 : f32 to vector<1x128xf32>
    %63 = arith.mulf %62, %60 : vector<1x128xf32>
    %64 = arith.addf %52, %63 : vector<1x128xf32>
    %c8 = arith.constant 8 : index
    %65 = memref.load %arg2[%c8] : memref<54xf32, #tpu.memory_space<smem>>
    %66 = vector.broadcast %65 : f32 to vector<1x128xf32>
    %67 = arith.mulf %66, %27 : vector<1x128xf32>
    %c24 = arith.constant 24 : index
    %68 = memref.load %arg2[%c24] : memref<54xf32, #tpu.memory_space<smem>>
    %69 = vector.broadcast %68 : f32 to vector<1x128xf32>
    %70 = arith.addf %67, %69 : vector<1x128xf32>
    %cst_16 = arith.constant 0.000000e+00 : f32
    %71 = vector.broadcast %cst_16 : f32 to vector<1x128xf32>
    %72 = arith.maximumf %70, %71 : vector<1x128xf32>
    %c40 = arith.constant 40 : index
    %73 = memref.load %arg2[%c40] : memref<54xf32, #tpu.memory_space<smem>>
    %74 = vector.broadcast %73 : f32 to vector<1x128xf32>
    %75 = arith.mulf %74, %72 : vector<1x128xf32>
    %76 = arith.addf %64, %75 : vector<1x128xf32>
    %c9 = arith.constant 9 : index
    %77 = memref.load %arg2[%c9] : memref<54xf32, #tpu.memory_space<smem>>
    %78 = vector.broadcast %77 : f32 to vector<1x128xf32>
    %79 = arith.mulf %78, %27 : vector<1x128xf32>
    %c25 = arith.constant 25 : index
    %80 = memref.load %arg2[%c25] : memref<54xf32, #tpu.memory_space<smem>>
    %81 = vector.broadcast %80 : f32 to vector<1x128xf32>
    %82 = arith.addf %79, %81 : vector<1x128xf32>
    %cst_17 = arith.constant 0.000000e+00 : f32
    %83 = vector.broadcast %cst_17 : f32 to vector<1x128xf32>
    %84 = arith.maximumf %82, %83 : vector<1x128xf32>
    %c41 = arith.constant 41 : index
    %85 = memref.load %arg2[%c41] : memref<54xf32, #tpu.memory_space<smem>>
    %86 = vector.broadcast %85 : f32 to vector<1x128xf32>
    %87 = arith.mulf %86, %84 : vector<1x128xf32>
    %88 = arith.addf %76, %87 : vector<1x128xf32>
    %c10 = arith.constant 10 : index
    %89 = memref.load %arg2[%c10] : memref<54xf32, #tpu.memory_space<smem>>
    %90 = vector.broadcast %89 : f32 to vector<1x128xf32>
    %91 = arith.mulf %90, %27 : vector<1x128xf32>
    %c26 = arith.constant 26 : index
    %92 = memref.load %arg2[%c26] : memref<54xf32, #tpu.memory_space<smem>>
    %93 = vector.broadcast %92 : f32 to vector<1x128xf32>
    %94 = arith.addf %91, %93 : vector<1x128xf32>
    %cst_18 = arith.constant 0.000000e+00 : f32
    %95 = vector.broadcast %cst_18 : f32 to vector<1x128xf32>
    %96 = arith.maximumf %94, %95 : vector<1x128xf32>
    %c42 = arith.constant 42 : index
    %97 = memref.load %arg2[%c42] : memref<54xf32, #tpu.memory_space<smem>>
    %98 = vector.broadcast %97 : f32 to vector<1x128xf32>
    %99 = arith.mulf %98, %96 : vector<1x128xf32>
    %100 = arith.addf %88, %99 : vector<1x128xf32>
    %c11 = arith.constant 11 : index
    %101 = memref.load %arg2[%c11] : memref<54xf32, #tpu.memory_space<smem>>
    %102 = vector.broadcast %101 : f32 to vector<1x128xf32>
    %103 = arith.mulf %102, %27 : vector<1x128xf32>
    %c27 = arith.constant 27 : index
    %104 = memref.load %arg2[%c27] : memref<54xf32, #tpu.memory_space<smem>>
    %105 = vector.broadcast %104 : f32 to vector<1x128xf32>
    %106 = arith.addf %103, %105 : vector<1x128xf32>
    %cst_19 = arith.constant 0.000000e+00 : f32
    %107 = vector.broadcast %cst_19 : f32 to vector<1x128xf32>
    %108 = arith.maximumf %106, %107 : vector<1x128xf32>
    %c43 = arith.constant 43 : index
    %109 = memref.load %arg2[%c43] : memref<54xf32, #tpu.memory_space<smem>>
    %110 = vector.broadcast %109 : f32 to vector<1x128xf32>
    %111 = arith.mulf %110, %108 : vector<1x128xf32>
    %112 = arith.addf %100, %111 : vector<1x128xf32>
    %c12 = arith.constant 12 : index
    %113 = memref.load %arg2[%c12] : memref<54xf32, #tpu.memory_space<smem>>
    %114 = vector.broadcast %113 : f32 to vector<1x128xf32>
    %115 = arith.mulf %114, %27 : vector<1x128xf32>
    %c28 = arith.constant 28 : index
    %116 = memref.load %arg2[%c28] : memref<54xf32, #tpu.memory_space<smem>>
    %117 = vector.broadcast %116 : f32 to vector<1x128xf32>
    %118 = arith.addf %115, %117 : vector<1x128xf32>
    %cst_20 = arith.constant 0.000000e+00 : f32
    %119 = vector.broadcast %cst_20 : f32 to vector<1x128xf32>
    %120 = arith.maximumf %118, %119 : vector<1x128xf32>
    %c44 = arith.constant 44 : index
    %121 = memref.load %arg2[%c44] : memref<54xf32, #tpu.memory_space<smem>>
    %122 = vector.broadcast %121 : f32 to vector<1x128xf32>
    %123 = arith.mulf %122, %120 : vector<1x128xf32>
    %124 = arith.addf %112, %123 : vector<1x128xf32>
    %c13 = arith.constant 13 : index
    %125 = memref.load %arg2[%c13] : memref<54xf32, #tpu.memory_space<smem>>
    %126 = vector.broadcast %125 : f32 to vector<1x128xf32>
    %127 = arith.mulf %126, %27 : vector<1x128xf32>
    %c29 = arith.constant 29 : index
    %128 = memref.load %arg2[%c29] : memref<54xf32, #tpu.memory_space<smem>>
    %129 = vector.broadcast %128 : f32 to vector<1x128xf32>
    %130 = arith.addf %127, %129 : vector<1x128xf32>
    %cst_21 = arith.constant 0.000000e+00 : f32
    %131 = vector.broadcast %cst_21 : f32 to vector<1x128xf32>
    %132 = arith.maximumf %130, %131 : vector<1x128xf32>
    %c45 = arith.constant 45 : index
    %133 = memref.load %arg2[%c45] : memref<54xf32, #tpu.memory_space<smem>>
    %134 = vector.broadcast %133 : f32 to vector<1x128xf32>
    %135 = arith.mulf %134, %132 : vector<1x128xf32>
    %136 = arith.addf %124, %135 : vector<1x128xf32>
    %c14 = arith.constant 14 : index
    %137 = memref.load %arg2[%c14] : memref<54xf32, #tpu.memory_space<smem>>
    %138 = vector.broadcast %137 : f32 to vector<1x128xf32>
    %139 = arith.mulf %138, %27 : vector<1x128xf32>
    %c30 = arith.constant 30 : index
    %140 = memref.load %arg2[%c30] : memref<54xf32, #tpu.memory_space<smem>>
    %141 = vector.broadcast %140 : f32 to vector<1x128xf32>
    %142 = arith.addf %139, %141 : vector<1x128xf32>
    %cst_22 = arith.constant 0.000000e+00 : f32
    %143 = vector.broadcast %cst_22 : f32 to vector<1x128xf32>
    %144 = arith.maximumf %142, %143 : vector<1x128xf32>
    %c46 = arith.constant 46 : index
    %145 = memref.load %arg2[%c46] : memref<54xf32, #tpu.memory_space<smem>>
    %146 = vector.broadcast %145 : f32 to vector<1x128xf32>
    %147 = arith.mulf %146, %144 : vector<1x128xf32>
    %148 = arith.addf %136, %147 : vector<1x128xf32>
    %c15 = arith.constant 15 : index
    %149 = memref.load %arg2[%c15] : memref<54xf32, #tpu.memory_space<smem>>
    %150 = vector.broadcast %149 : f32 to vector<1x128xf32>
    %151 = arith.mulf %150, %27 : vector<1x128xf32>
    %c31 = arith.constant 31 : index
    %152 = memref.load %arg2[%c31] : memref<54xf32, #tpu.memory_space<smem>>
    %153 = vector.broadcast %152 : f32 to vector<1x128xf32>
    %154 = arith.addf %151, %153 : vector<1x128xf32>
    %cst_23 = arith.constant 0.000000e+00 : f32
    %155 = vector.broadcast %cst_23 : f32 to vector<1x128xf32>
    %156 = arith.maximumf %154, %155 : vector<1x128xf32>
    %c47 = arith.constant 47 : index
    %157 = memref.load %arg2[%c47] : memref<54xf32, #tpu.memory_space<smem>>
    %158 = vector.broadcast %157 : f32 to vector<1x128xf32>
    %159 = arith.mulf %158, %156 : vector<1x128xf32>
    %160 = arith.addf %148, %159 : vector<1x128xf32>
    %c16 = arith.constant 16 : index
    %161 = memref.load %arg2[%c16] : memref<54xf32, #tpu.memory_space<smem>>
    %162 = vector.broadcast %161 : f32 to vector<1x128xf32>
    %163 = arith.mulf %162, %27 : vector<1x128xf32>
    %c32 = arith.constant 32 : index
    %164 = memref.load %arg2[%c32] : memref<54xf32, #tpu.memory_space<smem>>
    %165 = vector.broadcast %164 : f32 to vector<1x128xf32>
    %166 = arith.addf %163, %165 : vector<1x128xf32>
    %cst_24 = arith.constant 0.000000e+00 : f32
    %167 = vector.broadcast %cst_24 : f32 to vector<1x128xf32>
    %168 = arith.maximumf %166, %167 : vector<1x128xf32>
    %c48 = arith.constant 48 : index
    %169 = memref.load %arg2[%c48] : memref<54xf32, #tpu.memory_space<smem>>
    %170 = vector.broadcast %169 : f32 to vector<1x128xf32>
    %171 = arith.mulf %170, %168 : vector<1x128xf32>
    %172 = arith.addf %160, %171 : vector<1x128xf32>
    %c17 = arith.constant 17 : index
    %173 = memref.load %arg2[%c17] : memref<54xf32, #tpu.memory_space<smem>>
    %174 = vector.broadcast %173 : f32 to vector<1x128xf32>
    %175 = arith.mulf %174, %27 : vector<1x128xf32>
    %c33 = arith.constant 33 : index
    %176 = memref.load %arg2[%c33] : memref<54xf32, #tpu.memory_space<smem>>
    %177 = vector.broadcast %176 : f32 to vector<1x128xf32>
    %178 = arith.addf %175, %177 : vector<1x128xf32>
    %cst_25 = arith.constant 0.000000e+00 : f32
    %179 = vector.broadcast %cst_25 : f32 to vector<1x128xf32>
    %180 = arith.maximumf %178, %179 : vector<1x128xf32>
    %c49 = arith.constant 49 : index
    %181 = memref.load %arg2[%c49] : memref<54xf32, #tpu.memory_space<smem>>
    %182 = vector.broadcast %181 : f32 to vector<1x128xf32>
    %183 = arith.mulf %182, %180 : vector<1x128xf32>
    %184 = arith.addf %172, %183 : vector<1x128xf32>
    %c18 = arith.constant 18 : index
    %185 = memref.load %arg2[%c18] : memref<54xf32, #tpu.memory_space<smem>>
    %186 = vector.broadcast %185 : f32 to vector<1x128xf32>
    %187 = arith.mulf %186, %27 : vector<1x128xf32>
    %c34 = arith.constant 34 : index
    %188 = memref.load %arg2[%c34] : memref<54xf32, #tpu.memory_space<smem>>
    %189 = vector.broadcast %188 : f32 to vector<1x128xf32>
    %190 = arith.addf %187, %189 : vector<1x128xf32>
    %cst_26 = arith.constant 0.000000e+00 : f32
    %191 = vector.broadcast %cst_26 : f32 to vector<1x128xf32>
    %192 = arith.maximumf %190, %191 : vector<1x128xf32>
    %c50 = arith.constant 50 : index
    %193 = memref.load %arg2[%c50] : memref<54xf32, #tpu.memory_space<smem>>
    %194 = vector.broadcast %193 : f32 to vector<1x128xf32>
    %195 = arith.mulf %194, %192 : vector<1x128xf32>
    %196 = arith.addf %184, %195 : vector<1x128xf32>
    %c19 = arith.constant 19 : index
    %197 = memref.load %arg2[%c19] : memref<54xf32, #tpu.memory_space<smem>>
    %198 = vector.broadcast %197 : f32 to vector<1x128xf32>
    %199 = arith.mulf %198, %27 : vector<1x128xf32>
    %c35 = arith.constant 35 : index
    %200 = memref.load %arg2[%c35] : memref<54xf32, #tpu.memory_space<smem>>
    %201 = vector.broadcast %200 : f32 to vector<1x128xf32>
    %202 = arith.addf %199, %201 : vector<1x128xf32>
    %cst_27 = arith.constant 0.000000e+00 : f32
    %203 = vector.broadcast %cst_27 : f32 to vector<1x128xf32>
    %204 = arith.maximumf %202, %203 : vector<1x128xf32>
    %c51 = arith.constant 51 : index
    %205 = memref.load %arg2[%c51] : memref<54xf32, #tpu.memory_space<smem>>
    %206 = vector.broadcast %205 : f32 to vector<1x128xf32>
    %207 = arith.mulf %206, %204 : vector<1x128xf32>
    %208 = arith.addf %196, %207 : vector<1x128xf32>
    %c20 = arith.constant 20 : index
    %209 = memref.load %arg2[%c20] : memref<54xf32, #tpu.memory_space<smem>>
    %210 = vector.broadcast %209 : f32 to vector<1x128xf32>
    %211 = arith.mulf %210, %27 : vector<1x128xf32>
    %c36 = arith.constant 36 : index
    %212 = memref.load %arg2[%c36] : memref<54xf32, #tpu.memory_space<smem>>
    %213 = vector.broadcast %212 : f32 to vector<1x128xf32>
    %214 = arith.addf %211, %213 : vector<1x128xf32>
    %cst_28 = arith.constant 0.000000e+00 : f32
    %215 = vector.broadcast %cst_28 : f32 to vector<1x128xf32>
    %216 = arith.maximumf %214, %215 : vector<1x128xf32>
    %c52 = arith.constant 52 : index
    %217 = memref.load %arg2[%c52] : memref<54xf32, #tpu.memory_space<smem>>
    %218 = vector.broadcast %217 : f32 to vector<1x128xf32>
    %219 = arith.mulf %218, %216 : vector<1x128xf32>
    %220 = arith.addf %208, %219 : vector<1x128xf32>
    %c53 = arith.constant 53 : index
    %221 = memref.load %arg2[%c53] : memref<54xf32, #tpu.memory_space<smem>>
    %222 = vector.broadcast %221 : f32 to vector<1x128xf32>
    %223 = arith.addf %220, %222 : vector<1x128xf32>
    %c0_29 = arith.constant 0 : index
    %c0_30 = arith.constant 0 : index
    %224 = vector.load %arg3[%c0_29, %c0_30] : memref<1x128xf32, #tpu.memory_space<vmem>>, vector<1x128xf32>
    tpu.vector_store %arg3[%c0_29, %c0_30], %223 {strides = array<i32>} : memref<1x128xf32, #tpu.memory_space<vmem>>, vector<1x128xf32>,
    return
  }
  func.func @transform_0(%arg0: i32) -> (i32, i32, i32) {
    %c0_i32 = arith.constant 0 : i32
    %c0_i32_0 = arith.constant 0 : i32
    %c0_i32_1 = arith.constant 0 : i32
    return %c0_i32, %arg0, %c0_i32_0 : i32, i32, i32
  }
  func.func @transform_1(%arg0: i32) -> i32 {
    %c0_i32 = arith.constant 0 : i32
    %c0_i32_0 = arith.constant 0 : i32
    return %c0_i32 : i32
  }
  func.func @transform_2(%arg0: i32) -> (i32, i32) {
    %c0_i32 = arith.constant 0 : i32
    %c0_i32_0 = arith.constant 0 : i32
    return %arg0, %c0_i32 : i32, i32
  }
}

</mosaic_0001>

<bundles_post_ra>
// kernel: network_forward.1
= control target key start
LH: loop header
LB: loop body
LE: loop exit
PB: predicated region body
PF: predicated region fallthrough
CT: control target
= control target key end

     0   :  { %7 = vsyncpa [#allocation3], 0  ;;  %s306_s12 = smov [#allocation2]   ;;  %s424_s0 = inlined_call_operand.vmem [shape: f32[4,1,128], index: 0, kind: input, shape index: {}]   ;;  %s425_s1 = inlined_call_operand.vmem [shape: f32[54], index: 1, kind: input, shape index: {}]   ;;  %s426_s2 = inlined_call_operand.vmem [shape: f32[1,128], index: 2, kind: output, shape index: {}]  }
   0x1   :  { %s15_s11 = sshll.u32 %s425_s1, 4  ;;  %s16_s11 = int_to_ptr.vmem [resolvable:$true] %s15_s11 }
   0x2   :  { %18 = dma.vmem_to_smem %s16_s11, 16, %s306_s12, [#allocation3]  }
   0x3   :  { %304 = dma.done.wait [#allocation3], 16  }
   0x4   :  { %305 = vsyncadd [#allocation3], 4294967280 }
   0x5   :  { %23 = sfence }
   0x6   :  { %s24_s13 = sld [smem:[#allocation2]]  ;;  %v25_v0 = vld [vmem:[%s424_s0] sm:$0x1]  ;;  %v236_v1 = vld [vmem:[%s424_s0 + $0x1] sm:$0x1] }
   0x7   :  { %s235_s14 = sld [smem:[#allocation2 + $0x1]]  ;;  %v238_v3 = vld [vmem:[%s424_s0 + $0x2] sm:$0x1]  ;;  %v240_v6 = vld [vmem:[%s424_s0 + $0x3] sm:$0x1] }
   0x8   :  { %s237_s15 = sld [smem:[#allocation2 + $0x2]] }
   0x9   :  { %s239_s16 = sld [smem:[#allocation2 + $0x3]] }
   0xa   :  { %s241_s19 = sld [smem:[#allocation2 + $0x4]] }
   0xb   :  { %s331_s1 = sld [smem:[#allocation2 + $0x5]] }
   0xc   :  { %v26_v2 = vstv %s24_s13  ;;  %s336_s24 = sld [smem:[#allocation2 + $0x15]] }
   0xd   :  { %v27_v4 = vmul.f32 %v26_v2, %v25_v0  ;;  %v31_v5 = vstv %s235_s14  ;;  %s341_s27 = sld [smem:[#allocation2 + $0x25]] }
   0xe   :  { %v32_v7 = vmul.f32 %v236_v1, %v31_v5  ;;  %v37_v8 = vstv %s237_s15  ;;  %s245_s28 = sld [smem:[#allocation2 + $0x6]] }
   0xf   :  { %v38_v9 = vmul.f32 %v238_v3, %v37_v8  ;;  %v43_v10 = vstv %s239_s16  ;;  %s343_s29 = sld [smem:[#allocation2 + $0x16]] }
  0x10   :  { %v33_v11 = vadd.f32 %v32_v7, %v27_v4  ;;  %v44_v12 = vmul.f32 %v240_v6, %v43_v10  ;;  %s345_s30 = sld [smem:[#allocation2 + $0x26]]  ;;  %v47_v14 = vstv %s241_s19 }
  0x11   :  { %s248_s3 = sld [smem:[#allocation2 + $0x7]]  ;;  %v51_v17 = vstv %s331_s1 }
  0x12   :  { %v39_v13 = vadd.f32 %v38_v9, %v33_v11  ;;  %s249_s4 = sld [smem:[#allocation2 + $0x17]]  ;;  %v54_v21 = vstv %s336_s24 }
  0x13   :  { %s347_s0 = sld [smem:[#allocation2 + $0x27]]  ;;  %v58_v31 = vstv %s341_s27 }
  0x14   :  { %v45_v15 = vadd.f32 %v44_v12, %v39_v13  ;;  %s251_s5 = sld [smem:[#allocation2 + $0x8]]  ;;  %v62_v18 = vstv %s245_s28 }
  0x15   :  { %s252_s6 = sld [smem:[#allocation2 + $0x18]]  ;;  %v65_v22 = vstv %s343_s29 }
  0x16   :  { %v48_v16 = vadd.f32 %v47_v14, %v45_v15  ;;  %s349_s7 = sld [smem:[#allocation2 + $0x28]]  ;;  %v69_v34 = vstv %s345_s30 }
  0x17   :  { %v73_v19 = vstv %s248_s3  ;;  %s254_s8 = sld [smem:[#allocation2 + $0x9]] }
  0x18   :  { %v352_v20 = vmax.f32 %v48_v16, 0.0  ;;  %s354_s9 = sld [smem:[#allocation2 + $0x19]]  ;;  %v76_v23 = vstv %s249_s4 }
  0x19   :  { %s358_s10 = sld [smem:[#allocation2 + $0x29]]  ;;  %v80_v35 = vstv %s347_s0 }
  0x1a   :  { %v52_v24 = vmul.f32 %v51_v17, %v352_v20  ;;  %v63_v25 = vmul.f32 %v62_v18, %v352_v20  ;;  %v74_v26 = vmul.f32 %v73_v19, %v352_v20  ;;  %v84_v27 = vstv %s251_s5  ;;  %s363_s11 = sld [smem:[#allocation2 + $0xa]] }
  0x1b   :  { %v85_v28 = vmul.f32 %v84_v27, %v352_v20  ;;  %v87_v29 = vstv %s252_s6  ;;  %s366_s12 = sld [smem:[#allocation2 + $0x1a]] }
  0x1c   :  { %v55_v30 = vadd.f32 %v54_v21, %v52_v24  ;;  %v66_v32 = vadd.f32 %v65_v22, %v63_v25  ;;  %v77_v33 = vadd.f32 %v76_v23, %v74_v26  ;;  %s369_s13 = sld [smem:[#allocation2 + $0x2a]]  ;;  %v91_v43 = vstv %s349_s7 }
  0x1d   :  { %v88_v36 = vadd.f32 %v87_v29, %v85_v28  ;;  %v95_v37 = vstv %s254_s8  ;;  %s260_s14 = sld [smem:[#allocation2 + $0xb]] }
  0x1e   :  { %v56_v38 = vmax.f32 %v55_v30, 0.0  ;;  %v67_v39 = vmax.f32 %v66_v32, 0.0  ;;  %v78_v40 = vmax.f32 %v77_v33, 0.0  ;;  %v96_v41 = vmul.f32 %v95_v37, %v352_v20  ;;  %s374_s15 = sld [smem:[#allocation2 + $0x1b]] }
  0x1f   :  { %v89_v42 = vmax.f32 %v88_v36, 0.0  ;;  %v98_v44 = vstv %s354_s9  ;;  %s378_s16 = sld [smem:[#allocation2 + $0x2b]]  ;;  %v102_v49 = vstv %s358_s10 }
  0x20   :  { %v59_v45 = vmul.f32 %v58_v31, %v56_v38  ;;  %v70_v46 = vmul.f32 %v69_v34, %v67_v39  ;;  %v81_v47 = vmul.f32 %v80_v35, %v78_v40  ;;  %v99_v48 = vadd.f32 %v98_v44, %v96_v41  ;;  %s263_s17 = sld [smem:[#allocation2 + $0xc]] }
  0x21   :  { %v106_v50 = vstv %s363_s11  ;;  %v109_v51 = vstv %s366_s12  ;;  %s264_s18 = sld [smem:[#allocation2 + $0x1c]]  ;;  %v92_v53 = vmul.f32 %v91_v43, %v89_v42 }
  0x22   :  { %v71_v52 = vadd.f32 %v70_v46, %v59_v45  ;;  %v100_v54 = vmax.f32 %v99_v48, 0.0  ;;  %v107_v55 = vmul.f32 %v106_v50, %v352_v20  ;;  %s384_s19 = sld [smem:[#allocation2 + $0x2c]]  ;;  %v113_v61 = vstv %s369_s13 }
  0x23   :  { %v117_v56 = vstv %s260_s14  ;;  %s266_s20 = sld [smem:[#allocation2 + $0xd]] }
  0x24   :  { %v82_v57 = vadd.f32 %v81_v47, %v71_v52  ;;  %v103_v58 = vmul.f32 %v102_v49, %v100_v54  ;;  %v110_v59 = vadd.f32 %v109_v51, %v107_v55  ;;  %v118_v60 = vmul.f32 %v117_v56, %v352_v20  ;;  %s267_s21 = sld [smem:[#allocation2 + $0x1d]] }
  0x25   :  { %v120_v62 = vstv %s374_s15  ;;  %s389_s1 = sld [smem:[#allocation2 + $0x2d]]  ;;  %v124_v3 = vstv %s378_s16 }
  0x26   :  { %v93_v63 = vadd.f32 %v92_v53, %v82_v57  ;;  %v111_v0 = vmax.f32 %v110_v59, 0.0  ;;  %v121_v1 = vadd.f32 %v120_v62, %v118_v60  ;;  %v128_v2 = vstv %s263_s17  ;;  %s269_s22 = sld [smem:[#allocation2 + $0xe]] }
  0x27   :  { %v129_v4 = vmul.f32 %v128_v2, %v352_v20  ;;  %v131_v5 = vstv %s264_s18  ;;  %s270_s23 = sld [smem:[#allocation2 + $0x1e]] }
  0x28   :  { %v104_v6 = vadd.f32 %v103_v58, %v93_v63  ;;  %v114_v7 = vmul.f32 %v113_v61, %v111_v0  ;;  %v122_v8 = vmax.f32 %v121_v1, 0.0  ;;  %s393_s24 = sld [smem:[#allocation2 + $0x2e]]  ;;  %v135_v10 = vstv %s384_s19 }
  0x29   :  { %v132_v9 = vadd.f32 %v131_v5, %v129_v4  ;;  %v139_v11 = vstv %s266_s20  ;;  %s272_s25 = sld [smem:[#allocation2 + $0xf]] }
  0x2a   :  { %v115_v12 = vadd.f32 %v114_v7, %v104_v6  ;;  %v125_v13 = vmul.f32 %v124_v3, %v122_v8  ;;  %v140_v14 = vmul.f32 %v139_v11, %v352_v20  ;;  %v142_v15 = vstv %s267_s21  ;;  %s273_s26 = sld [smem:[#allocation2 + $0x1f]] }
  0x2b   :  { %v133_v16 = vmax.f32 %v132_v9, 0.0  ;;  %s397_s27 = sld [smem:[#allocation2 + $0x2f]]  ;;  %v146_v22 = vstv %s389_s1 }
  0x2c   :  { %v126_v17 = vadd.f32 %v125_v13, %v115_v12  ;;  %v143_v18 = vadd.f32 %v142_v15, %v140_v14  ;;  %v150_v19 = vstv %s269_s22  ;;  %s275_s28 = sld [smem:[#allocation2 + $0x10]] }
  0x2d   :  { %v136_v21 = vmul.f32 %v135_v10, %v133_v16  ;;  %v151_v23 = vmul.f32 %v150_v19, %v352_v20  ;;  %v153_v24 = vstv %s270_s23  ;;  %s276_s29 = sld [smem:[#allocation2 + $0x20]] }
  0x2e   :  { %v144_v25 = vmax.f32 %v143_v18, 0.0  ;;  %s401_s30 = sld [smem:[#allocation2 + $0x30]]  ;;  %v157_v30 = vstv %s393_s24 }
  0x2f   :  { %v137_v26 = vadd.f32 %v136_v21, %v126_v17  ;;  %v154_v27 = vadd.f32 %v153_v24, %v151_v23  ;;  %v161_v28 = vstv %s272_s25  ;;  %s278_s3 = sld [smem:[#allocation2 + $0x11]] }
  0x30   :  { %v147_v29 = vmul.f32 %v146_v22, %v144_v25  ;;  %v162_v31 = vmul.f32 %v161_v28, %v352_v20  ;;  %v164_v32 = vstv %s273_s26  ;;  %s279_s4 = sld [smem:[#allocation2 + $0x21]] }
  0x31   :  { %v155_v33 = vmax.f32 %v154_v27, 0.0  ;;  %s405_s0 = sld [smem:[#allocation2 + $0x31]]  ;;  %v168_v38 = vstv %s397_s27 }
  0x32   :  { %v148_v34 = vadd.f32 %v147_v29, %v137_v26  ;;  %v165_v35 = vadd.f32 %v164_v32, %v162_v31  ;;  %v172_v36 = vstv %s275_s28  ;;  %s281_s5 = sld [smem:[#allocation2 + $0x12]] }
  0x33   :  { %v158_v37 = vmul.f32 %v157_v30, %v155_v33  ;;  %v173_v39 = vmul.f32 %v172_v36, %v352_v20  ;;  %v175_v40 = vstv %s276_s29  ;;  %s282_s6 = sld [smem:[#allocation2 + $0x22]] }
  0x34   :  { %v166_v41 = vmax.f32 %v165_v35, 0.0  ;;  %s409_s7 = sld [smem:[#allocation2 + $0x32]]  ;;  %v179_v46 = vstv %s401_s30 }
  0x35   :  { %v159_v42 = vadd.f32 %v158_v37, %v148_v34  ;;  %v176_v43 = vadd.f32 %v175_v40, %v173_v39  ;;  %v183_v44 = vstv %s278_s3  ;;  %s284_s8 = sld [smem:[#allocation2 + $0x13]] }
  0x36   :  { %v169_v45 = vmul.f32 %v168_v38, %v166_v41  ;;  %v184_v47 = vmul.f32 %v183_v44, %v352_v20  ;;  %v186_v48 = vstv %s279_s4  ;;  %s285_s9 = sld [smem:[#allocation2 + $0x23]] }
  0x37   :  { %v177_v49 = vmax.f32 %v176_v43, 0.0  ;;  %s413_s10 = sld [smem:[#allocation2 + $0x33]]  ;;  %v190_v54 = vstv %s405_s0 }
  0x38   :  { %v170_v50 = vadd.f32 %v169_v45, %v159_v42  ;;  %v187_v51 = vadd.f32 %v186_v48, %v184_v47  ;;  %v194_v52 = vstv %s281_s5  ;;  %s287_s11 = sld [smem:[#allocation2 + $0x14]] }
  0x39   :  { %v180_v53 = vmul.f32 %v179_v46, %v177_v49  ;;  %v195_v55 = vmul.f32 %v194_v52, %v352_v20  ;;  %v197_v56 = vstv %s282_s6  ;;  %s288_s12 = sld [smem:[#allocation2 + $0x24]] }
  0x3a   :  { %v188_v57 = vmax.f32 %v187_v51, 0.0  ;;  %s289_s13 = sld [smem:[#allocation2 + $0x34]]  ;;  %v201_v62 = vstv %s409_s7 }
  0x3b   :  { %v181_v58 = vadd.f32 %v180_v53, %v170_v50  ;;  %v198_v59 = vadd.f32 %v197_v56, %v195_v55  ;;  %v205_v60 = vstv %s284_s8  ;;  %s290_s14 = sld [smem:[#allocation2 + $0x35]] }
  0x3c   :  { %v191_v61 = vmul.f32 %v190_v54, %v188_v57  ;;  %v206_v63 = vmul.f32 %v205_v60, %v352_v20  ;;  %v208_v0 = vstv %s285_s9 }
  0x3d   :  { %v199_v1 = vmax.f32 %v198_v59, 0.0  ;;  %v212_v6 = vstv %s413_s10 }
  0x3e   :  { %v192_v2 = vadd.f32 %v191_v61, %v181_v58  ;;  %v209_v3 = vadd.f32 %v208_v0, %v206_v63  ;;  %v216_v4 = vstv %s287_s11 }
  0x3f   :  { %v202_v5 = vmul.f32 %v201_v62, %v199_v1  ;;  %v217_v7 = vmul.f32 %v216_v4, %v352_v20  ;;  %v219_v8 = vstv %s288_s12 }
  0x40   :  { %v210_v9 = vmax.f32 %v209_v3, 0.0  ;;  %v223_v13 = vstv %s289_s13 }
  0x41   :  { %v203_v10 = vadd.f32 %v202_v5, %v192_v2  ;;  %v220_v11 = vadd.f32 %v219_v8, %v217_v7  ;;  %v227_v17 = vstv %s290_s14 }
  0x42   :  { %v213_v12 = vmul.f32 %v212_v6, %v210_v9 }
  0x43   :  { %v221_v14 = vmax.f32 %v220_v11, 0.0 }
  0x44   :  { %v214_v15 = vadd.f32 %v213_v12, %v203_v10 }
  0x45   :  { %v224_v16 = vmul.f32 %v223_v13, %v221_v14 }
  0x47   :  { %v225_v18 = vadd.f32 %v224_v16, %v214_v15 }
  0x49   :  { %v228_v19 = vadd.f32 %v227_v17, %v225_v18 }
  0x4b   :  { %229 = vst [vmem:[%s426_s2] sm:$0x1] %v228_v19 }
  0x4c   :  { %234 = vsyncpa [#allocation3], 1 }

</bundles_post_ra>
